<compile_context>
chip_gen: v5e
topology: v5e:2x2
jax: 0.10.0
libtpu: 0.0.40
codegen_flags: <defaults>
</compile_context>

<pallas_src>
import functools

import jax
import jax.numpy as jnp
from jax.experimental import pallas as pl
from jax.experimental.pallas import tpu as pltpu


def _round_up(x, m):
    return (x + m - 1) // m * m


def _ncf_prior_kernel(kp, np_, x_ref, w_ref, v_ref, out_ref):
    """One batch tile of fused f_diff + scale * f_prior.

    x_ref : (TB, kp)  bf16  packed [user_emb | item_emb | dense | 0-pad]
    w_ref : (kp+np_, np_) bf16
            rows [0:kp)       W1  (cols 0..H1-1 = w1d, cols H1..H1+HP-1 = w1p on dense rows)
            rows [kp:kp+np_)  W2  (cols 0..H2-1 = w2d, col H2 = scale*w2p on prior rows)
    v_ref : (8, np_) f32
            row 0: layer-1 bias   [b1d | b1p | 0]
            row 1: layer-2 bias   [b2d | (b3d + scale*b2p) at lane H2 | 0]
            row 2: relu-head vec  [w3d | 0]
            row 3: linear-head vec[0 .. 1 at lane H2 .. 0]
    out_ref: (1, 1, TB) f32   lane-dense scores
    """
    f32 = jnp.float32

    # ---- fused layer 1 (diff) + prior hidden layer: one MXU call ----------------
    a = jnp.dot(x_ref[...], w_ref[0:kp, :], preferred_element_type=f32)
    a = jnp.maximum(a + v_ref[0:1, :], 0.0)                       # (TB, np_) f32

    # ---- fused layer 2 (diff) + scaled prior output head: one MXU call ----------
    z = jnp.dot(a.astype(jnp.bfloat16), w_ref[kp:kp + np_, :],
                preferred_element_type=f32)                       # (TB, np_) f32
    zb = z + v_ref[1:2, :]          # lane H2 now carries scaled prior score + folded bias

    # ---- single combined head: relu lanes * w3d  +  linear lane H2 --------------
    y = jnp.sum(jnp.maximum(zb, 0.0) * v_ref[2:3, :] + zb * v_ref[3:4, :],
                axis=-1, keepdims=True)                           # (TB, 1)
    out_ref[...] = y.reshape(1, 1, -1).astype(out_ref.dtype)      # lane-dense (1,1,TB)


def ncf_with_prior(user, item, dense, params, *, scale=5.0, join_dim=1, tb=4096):
    """JAX wrapper: gather + slab packing (glue); the two fused MLPs run in Pallas."""
    assert join_dim == 1, "features are concatenated along axis 1"
    bf16, f32 = jnp.bfloat16, jnp.float32

    e_dim = params["user_emb"].shape[1]
    d_dim = dense.shape[1]
    h1 = params["w1d"].shape[1]
    h2 = params["w2d"].shape[1]
    hp = params["w1p"].shape[1]
    k_in = 2 * e_dim + d_dim
    assert params["w1d"].shape[0] == k_in
    assert params["w2d"].shape[0] == h1 and params["w2p"].shape[0] == hp

    kp = _round_up(k_in, 128)                      # padded contraction dim (lane-dense X)
    np_ = _round_up(max(h1 + hp, h2 + 1), 128)     # padded hidden width
    c_p = h2                                       # lane carrying the scaled prior score
    assert h1 + hp <= np_ and c_p < np_

    # ---- packed weight slab: W1 (kp, np_) stacked on W2 (np_, np_), bf16 --------
    w1 = jnp.zeros((kp, np_), f32)
    w1 = w1.at[0:k_in, 0:h1].set(params["w1d"].astype(f32))
    w1 = w1.at[2 * e_dim:k_in, h1:h1 + hp].set(params["w1p"].astype(f32))
    w2 = jnp.zeros((np_, np_), f32)
    w2 = w2.at[0:h1, 0:h2].set(params["w2d"].astype(f32))
    w2 = w2.at[h1:h1 + hp, c_p].set(scale * params["w2p"][:, 0].astype(f32))
    w_slab = jnp.concatenate([w1, w2], axis=0).astype(bf16)       # (kp+np_, np_) bf16

    # ---- bias / head-vector slab (f32), 8 sublanes -------------------------------
    b1_row = (jnp.zeros((np_,), f32)
              .at[0:h1].set(params["b1d"].reshape(-1).astype(f32))
              .at[h1:h1 + hp].set(params["b1p"].reshape(-1).astype(f32)))
    out_bias = (params["b3d"].reshape(-1)[0]
                + scale * params["b2p"].reshape(-1)[0]).astype(f32)
    b2_row = (jnp.zeros((np_,), f32)
              .at[0:h2].set(params["b2d"].reshape(-1).astype(f32))
              .at[c_p].set(out_bias))
    head_relu = jnp.zeros((np_,), f32).at[0:h2].set(params["w3d"][:, 0].astype(f32))
    head_lin = jnp.zeros((np_,), f32).at[c_p].set(1.0)
    v_slab = (jnp.zeros((8, np_), f32)
              .at[0].set(b1_row).at[1].set(b2_row)
              .at[2].set(head_relu).at[3].set(head_lin))

    # ---- packed activation slab: one lane-dense bf16 DMA per tile ---------------
    b = user.shape[0]
    x = jnp.concatenate(
        [params["user_emb"][user].astype(bf16),
         params["item_emb"][item].astype(bf16),
         dense.astype(bf16),
         jnp.zeros((b, kp - k_in), bf16)], axis=1)                # (B, kp)

    # ---- batch tiling: 128-aligned tiles, >=2 even tiles once b >= 512 (v7x) ----
    tb_cap = _round_up(max(tb, 128), 128)
    b128 = _round_up(b, 128)
    if b128 <= tb_cap:
        tb_eff = _round_up(b, 256) // 2 if b128 >= 512 else b128
    else:
        tb_eff = tb_cap
    b_pad = _round_up(b, tb_eff)
    ntiles = b_pad // tb_eff
    if b_pad != b:
        x = jnp.pad(x, ((0, b_pad - b), (0, 0)))

    flops = 2 * b_pad * (kp * np_ + np_ * np_) + 6 * b_pad * np_
    bytes_accessed = (2 * b_pad * kp            # bf16 activations in
                      + 2 * w_slab.size + 4 * v_slab.size   # weights/vectors (once)
                      + 4 * b_pad)              # f32 scores out

    kern = functools.partial(_ncf_prior_kernel, kp, np_)
    out = pl.pallas_call(
        kern,
        out_shape=jax.ShapeDtypeStruct((ntiles, 1, tb_eff), jnp.float32),
        grid=(ntiles,),
        in_specs=[
            pl.BlockSpec((tb_eff, kp), lambda i: (i, 0)),    # packed activation tile
            pl.BlockSpec(w_slab.shape, lambda i: (0, 0)),    # weight slab (VMEM-resident)
            pl.BlockSpec(v_slab.shape, lambda i: (0, 0)),    # bias/head-vector slab
        ],
        out_specs=pl.BlockSpec((1, 1, tb_eff), lambda i: (i, 0, 0)),
        compiler_params=pltpu.CompilerParams(
            dimension_semantics=("parallel",)),
        cost_estimate=pl.CostEstimate(flops=flops, transcendentals=0,
                                      bytes_accessed=bytes_accessed),
    )(x, w_slab, v_slab)

    return out.reshape(b_pad, 1)[:b]                         # back to (B, 1)


def _init_params(key, *, num_users, num_items, emb_dim, dense_dim,
                 h1_diff, h2_diff, h_prior):
    ks = jax.random.split(key, 12)
    s = 0.1
    d_in_diff = 2 * emb_dim + dense_dim
    return {
        # learnable (f_diff) parameters
        "user_emb": s * jax.random.normal(ks[0], (num_users, emb_dim), jnp.float32),
        "item_emb": s * jax.random.normal(ks[1], (num_items, emb_dim), jnp.float32),
        "w1d": s * jax.random.normal(ks[2], (d_in_diff, h1_diff), jnp.float32),
        "b1d": s * jax.random.normal(ks[3], (1, h1_diff), jnp.float32),
        "w2d": s * jax.random.normal(ks[4], (h1_diff, h2_diff), jnp.float32),
        "b2d": s * jax.random.normal(ks[5], (1, h2_diff), jnp.float32),
        "w3d": s * jax.random.normal(ks[6], (h2_diff, 1), jnp.float32),
        "b3d": s * jax.random.normal(ks[7], (1, 1), jnp.float32),
        # immutable prior (f_prior) parameters
        "w1p": s * jax.random.normal(ks[8], (dense_dim, h_prior), jnp.float32),
        "b1p": s * jax.random.normal(ks[9], (1, h_prior), jnp.float32),
        "w2p": s * jax.random.normal(ks[10], (h_prior, 1), jnp.float32),
        "b2p": s * jax.random.normal(ks[11], (1, 1), jnp.float32),
    }


def _reference(user, item, dense, params, *, scale=5.0):
    """Pure-JAX reference mirroring the module (bf16 MXU operands, f32 accumulate)."""
    bf16, f32 = jnp.bfloat16, jnp.float32
    u = params["user_emb"][user].astype(bf16)
    it = params["item_emb"][item].astype(bf16)
    dn = dense.astype(bf16)
    x = jnp.concatenate([u, it, dn], axis=1)
    h = jnp.maximum(jnp.dot(x, params["w1d"].astype(bf16),
                            preferred_element_type=f32) + params["b1d"], 0.0)
    h2 = jnp.maximum(jnp.dot(h.astype(bf16), params["w2d"].astype(bf16),
                             preferred_element_type=f32) + params["b2d"], 0.0)
    y_diff = jnp.dot(h2, params["w3d"], preferred_element_type=f32) + params["b3d"]
    hp = jnp.maximum(jnp.dot(dn, params["w1p"].astype(bf16),
                             preferred_element_type=f32) + params["b1p"], 0.0)
    y_prior = jnp.dot(hp.astype(bf16), params["w2p"].astype(bf16),
                      preferred_element_type=f32) + params["b2p"]
    return y_diff + scale * y_prior


if __name__ == "__main__":
    NUM_USERS, NUM_ITEMS = 32, 32
    EMB, DENSE = 16, 32
    H1D, H2D, HP = 64, 32, 32
    SCALE = 5.0

    key = jax.random.PRNGKey(0)
    k_params, k_rest = jax.random.split(key)
    params = _init_params(k_params, num_users=NUM_USERS, num_items=NUM_ITEMS,
                          emb_dim=EMB, dense_dim=DENSE,
                          h1_diff=H1D, h2_diff=H2D, h_prior=HP)

    ok = True
    # case 1: small batch            -> single 128-row tile
    # case 2: B=300, tb=256          -> multi-tile grid (2 tiles) + row padding
    # case 3: B=600, default tb=4096 -> auto-split into 2 even tiles (megacore path)
    for case_i, (B, tb) in enumerate([(8, 4096), (300, 256), (600, 4096)]):
        ku, ki, kd = jax.random.split(jax.random.fold_in(k_rest, case_i), 3)
        user = jax.random.randint(ku, (B,), 0, NUM_USERS, dtype=jnp.int32)
        item = jax.random.randint(ki, (B,), 0, NUM_ITEMS, dtype=jnp.int32)
        dense_features = jax.random.normal(kd, (B, DENSE), jnp.float32)

        out = ncf_with_prior(user, item, dense_features, params,
                             scale=SCALE, tb=tb)
        out = jax.block_until_ready(out)
        ref = _reference(user, item, dense_features, params, scale=SCALE)

        ok &= out.shape == (B, 1)
        ok &= bool(jnp.allclose(out, ref, atol=5e-3, rtol=5e-3))

    assert ok, "Pallas output mismatch"
    print("KERNEL_OK")
</pallas_src>

<mosaic_0001>
module attributes {stable_mosaic.version = 11 : i64} {
  func.func @_ncf_prior_kernel(%arg0: i32, %arg1: memref<128x128xbf16, #tpu.memory_space<vmem>>, %arg2: memref<256x128xbf16, #tpu.memory_space<vmem>>, %arg3: memref<8x128xf32, #tpu.memory_space<vmem>>, %arg4: memref<1x1x128xf32, #tpu.memory_space<vmem>>) attributes {dimension_semantics = [#tpu.dimension_semantics<parallel>], iteration_bounds = array<i64: 1>, scalar_prefetch = 0 : i64, scratch_operands = 0 : i64, tpu.core_type = #tpu.core_type<tc>, window_params = [{transform_indices = @transform_0, window_bounds = array<i64: 128, 128>}, {pipeline_mode = #tpu.pipeline_mode<synchronous>, transform_indices = @transform_1, window_bounds = array<i64: 256, 128>}, {pipeline_mode = #tpu.pipeline_mode<synchronous>, transform_indices = @transform_2, window_bounds = array<i64: 8, 128>}, {transform_indices = @transform_3, window_bounds = array<i64: 1, 1, 128>}]} {
    %c0 = arith.constant 0 : index
    %c0_0 = arith.constant 0 : index
    %0 = vector.load %arg1[%c0, %c0_0] : memref<128x128xbf16, #tpu.memory_space<vmem>>, vector<128x128xbf16>
    %c0_1 = arith.constant 0 : index
    %c0_2 = arith.constant 0 : index
    %1 = vector.load %arg2[%c0_1, %c0_2] : memref<256x128xbf16, #tpu.memory_space<vmem>>, vector<128x128xbf16>
    %cst = arith.constant dense<0.000000e+00> : vector<128x128xf32>
    %2 = tpu.matmul %0, %1, %cst {dimension_numbers = #tpu.dot_dimension_numbers<[1], [0], [0], [1], [0, 0, 1, 1], [], []>} : vector<128x128xbf16>, vector<128x128xbf16>, vector<128x128xf32> -> vector<128x128xf32>
    %c0_3 = arith.constant 0 : index
    %c0_4 = arith.constant 0 : index
    %3 = vector.load %arg3[%c0_3, %c0_4] : memref<8x128xf32, #tpu.memory_space<vmem>>, vector<1x128xf32>
    %4 = vector.broadcast %3 : vector<1x128xf32> to vector<128x128xf32>
    %5 = arith.addf %2, %4 : vector<128x128xf32>
    %cst_5 = arith.constant 0.000000e+00 : f32
    %6 = vector.broadcast %cst_5 : f32 to vector<128x128xf32>
    %7 = arith.maximumf %5, %6 : vector<128x128xf32>
    %8 = arith.truncf %7 : vector<128x128xf32> to vector<128x128xbf16>
    %c128 = arith.constant 128 : index
    %c0_6 = arith.constant 0 : index
    %9 = vector.load %arg2[%c128, %c0_6] : memref<256x128xbf16, #tpu.memory_space<vmem>>, vector<128x128xbf16>
    %cst_7 = arith.constant dense<0.000000e+00> : vector<128x128xf32>
    %10 = tpu.matmul %8, %9, %cst_7 {dimension_numbers = #tpu.dot_dimension_numbers<[1], [0], [0], [1], [0, 0, 1, 1], [], []>} : vector<128x128xbf16>, vector<128x128xbf16>, vector<128x128xf32> -> vector<128x128xf32>
    %c1 = arith.constant 1 : index
    %c0_8 = arith.constant 0 : index
    %11 = vector.load %arg3[%c1, %c0_8] : memref<8x128xf32, #tpu.memory_space<vmem>>, vector<1x128xf32>
    %12 = vector.broadcast %11 : vector<1x128xf32> to vector<128x128xf32>
    %13 = arith.addf %10, %12 : vector<128x128xf32>
    %cst_9 = arith.constant 0.000000e+00 : f32
    %14 = vector.broadcast %cst_9 : f32 to vector<128x128xf32>
    %15 = arith.maximumf %13, %14 : vector<128x128xf32>
    %c2 = arith.constant 2 : index
    %c0_10 = arith.constant 0 : index
    %16 = vector.load %arg3[%c2, %c0_10] : memref<8x128xf32, #tpu.memory_space<vmem>>, vector<1x128xf32>
    %17 = vector.broadcast %16 : vector<1x128xf32> to vector<128x128xf32>
    %18 = arith.mulf %15, %17 : vector<128x128xf32>
    %c3 = arith.constant 3 : index
    %c0_11 = arith.constant 0 : index
    %19 = vector.load %arg3[%c3, %c0_11] : memref<8x128xf32, #tpu.memory_space<vmem>>, vector<1x128xf32>
    %20 = vector.broadcast %19 : vector<1x128xf32> to vector<128x128xf32>
    %21 = arith.mulf %13, %20 : vector<128x128xf32>
    %22 = arith.addf %18, %21 : vector<128x128xf32>
    %cst_12 = arith.constant dense<0.000000e+00> : vector<128xf32>
    %23 = vector.multi_reduction <add>, %22, %cst_12 [1] : vector<128x128xf32> to vector<128xf32>
    %24 = vector.shape_cast %23 : vector<128xf32> to vector<128x1xf32>
    %25 = vector.shape_cast %24 : vector<128x1xf32> to vector<1x1x128xf32>
    %c0_13 = arith.constant 0 : index
    %c0_14 = arith.constant 0 : index
    %c0_15 = arith.constant 0 : index
    %26 = vector.load %arg4[%c0_13, %c0_14, %c0_15] : memref<1x1x128xf32, #tpu.memory_space<vmem>>, vector<1x1x128xf32>
    tpu.vector_store %arg4[%c0_13, %c0_14, %c0_15], %25 {strides = array<i32>} : memref<1x1x128xf32, #tpu.memory_space<vmem>>, vector<1x1x128xf32>,
    return
  }
  func.func @transform_0(%arg0: i32) -> (i32, i32) {
    %c0_i32 = arith.constant 0 : i32
    %c0_i32_0 = arith.constant 0 : i32
    return %arg0, %c0_i32 : i32, i32
  }
  func.func @transform_1(%arg0: i32) -> (i32, i32) {
    %c0_i32 = arith.constant 0 : i32
    %c0_i32_0 = arith.constant 0 : i32
    %c0_i32_1 = arith.constant 0 : i32
    return %c0_i32, %c0_i32_0 : i32, i32
  }
  func.func @transform_2(%arg0: i32) -> (i32, i32) {
    %c0_i32 = arith.constant 0 : i32
    %c0_i32_0 = arith.constant 0 : i32
    %c0_i32_1 = arith.constant 0 : i32
    return %c0_i32, %c0_i32_0 : i32, i32
  }
  func.func @transform_3(%arg0: i32) -> (i32, i32, i32) {
    %c0_i32 = arith.constant 0 : i32
    %c0_i32_0 = arith.constant 0 : i32
    %c0_i32_1 = arith.constant 0 : i32
    return %arg0, %c0_i32, %c0_i32_0 : i32, i32, i32
  }
}

</mosaic_0001>

<bundles_post_ra>
// kernel: tpu_custom_call.1
= control target key start
LH: loop header
LB: loop body
LE: loop exit
PB: predicated region body
PF: predicated region fallthrough
CT: control target
= control target key end

     0   :  { %8 = vsyncpa [#allocation3], 0  ;;  %s917_s0 = inlined_call_operand.hbm [shape: bf16[128,128], index: 0, kind: input, shape index: {}]   ;;  %s918_s1 = inlined_call_operand.hbm [shape: bf16[256,128], index: 1, kind: input, shape index: {}]   ;;  %s919_s2 = inlined_call_operand.hbm [shape: f32[8,128], index: 2, kind: input, shape index: {}]   ;;  %s920_s3 = inlined_call_operand.hbm [shape: f32[1,1,128], index: 3, kind: output, shape index: {}]  }
   0x1   :  { %9 = vsyncpa [#allocation6], 0 }
   0x2   :  { %10 = vsyncpa [#allocation4], 0  ;;  %s28_s14 = sshll.u32 %s918_s1, 4  ;;  %s825_s15 = smov [#allocation5]   ;;  %s29_s14 = int_to_ptr.hbm [resolvable:$true] %s28_s14 }
   0x3   :  { %s30_s16 = sshll.u32 %s825_s15, 4  ;;  %s15_s19 = sshll.u32 %s917_s0, 4  ;;  %s31_s16 = int_to_ptr.vmem [resolvable:$true] %s30_s16  ;;  %s16_s19 = int_to_ptr.hbm [resolvable:$true] %s15_s19 }
   0x4   :  { %s826_s20 = smov 64   ;;  %s827_s21 = smov 4  }
   0x5   :  { %36 = dma.hbm_to_vmem [thread:$0]  %s29_s14, 2048, %s31_s16, [#allocation6], %s826_s20, %s826_s20, %s827_s21  }
   0x6   :  { %s828_s22 = smov [#allocation2]   ;;  %s42_s26 = sshll.u32 %s919_s2, 4  ;;  %s43_s26 = int_to_ptr.hbm [resolvable:$true] %s42_s26 }
   0x7   :  { %s17_s23 = sshll.u32 %s828_s22, 4  ;;  %s829_s1 = smov [#allocation7]   ;;  %s18_s23 = int_to_ptr.vmem [resolvable:$true] %s17_s23 }
   0x8   :  { %23 = dma.hbm_to_vmem [thread:$0]  %s16_s19, 1024, %s18_s23, [#allocation3], %s826_s20, %s826_s20, %s827_s21  }
   0x9   :  { %s44_s27 = sshll.u32 %s829_s1, 4  ;;  %s45_s27 = int_to_ptr.vmem [resolvable:$true] %s44_s27 }
   0xa   :  { %47 = dma.hbm_to_vmem [thread:$0]  %s43_s26, 128, %s45_s27, [#allocation6]  }
   0xb   :  { %819 = dma.done.wait [#allocation3], 1024  }
   0xc   :  { %820 = vsyncadd [#allocation3], 4294966272 }
   0xd   :  { %821 = dma.done.wait [#allocation6], 2176  }
   0xe   :  { %822 = vsyncadd [#allocation6], 4294965120  ;;  %v688_v0 = vld [vmem:[#allocation5 + $0x38] sm:$0xff]  ;;  %v687_v1 = vld [vmem:[#allocation5 + $0x30] sm:$0xff]  ;;  %vm499_vm0 = vcmask 130112   ;;  %vm503_vm1 = vcmask 195712  }
   0xf   :  { %190 = vmatpush.bf16.msra.mxu0 %v688_v0  ;;  %697 = vmatpush.bf16.msra.mxu2 %v688_v0  ;;  %v686_v2 = vld [vmem:[#allocation5 + $0x28] sm:$0xff]  ;;  %v685_v3 = vld [vmem:[#allocation5 + $0x20] sm:$0xff]  ;;  %v684_v4 = vld [vmem:[#allocation5 + $0x18] sm:$0xff]  ;;  %vm507_vm2 = vcmask 261312   ;;  %vm511_vm3 = vcmask 326912   ;;  %vm515_vm4 = vcmask 392512  }
  0x10   :  { %v683_v5 = vld [vmem:[#allocation5 + $0x10] sm:$0xff]  ;;  %v682_v6 = vld [vmem:[#allocation5 + $0x8] sm:$0xff]  ;;  %v681_v7 = vld [vmem:[#allocation5] sm:$0xff]  ;;  %vm519_vm5 = vcmask 458112   ;;  %vm523_vm6 = vcmask 523712   ;;  %vm527_vm7 = vcmask 589312  }
  0x11   :  { %v673_v8 = vld [vmem:[#allocation2] sm:$0xff]  ;;  %v674_v10 = vld [vmem:[#allocation2 + $0x8] sm:$0xff]  ;;  %v696_v12 = vld [vmem:[#allocation5 + $0x78] sm:$0xff]  ;;  %vm531_vm8 = vcmask 654912   ;;  %vm535_vm9 = vcmask 720512   ;;  %vm539_vm10 = vcmask 786112  }
  0x12   :  { %v677_v9 = vld [vmem:[#allocation2 + $0x20] sm:$0xff]  ;;  %v678_v11 = vld [vmem:[#allocation2 + $0x28] sm:$0xff]  ;;  %329 = vmatpush.bf16.msra.mxu1 %v696_v12  ;;  %v695_v13 = vld [vmem:[#allocation5 + $0x70] sm:$0xff]  ;;  %705 = vmatpush.bf16.msra.mxu3 %v696_v12  ;;  %vm543_vm11 = vcmask 851712   ;;  %vm547_vm12 = vcmask 917312   ;;  %vm551_vm13 = vcmask 982912  }
  0x13   :  { %191 = vmatpush.bf16.msra.mxu0 %v687_v1  ;;  %698 = vmatpush.bf16.msra.mxu2 %v687_v1  ;;  %v694_v14 = vld [vmem:[#allocation5 + $0x68] sm:$0xff]  ;;  %v693_v15 = vld [vmem:[#allocation5 + $0x60] sm:$0xff]  ;;  %v675_v16 = vld [vmem:[#allocation2 + $0x10] sm:$0xff]  ;;  %s830_s0 = smov [#allocation8]   ;;  %s566_s30 = sshll.u32 %s920_s3, 4  ;;  %vm555_vm14 = vcmask 1048512   ;;  %s567_s30 = int_to_ptr.hbm [resolvable:$true] %s566_s30 }
  0x14   :  { %v679_v17 = vld [vmem:[#allocation2 + $0x30] sm:$0xff]  ;;  %v676_v18 = vld [vmem:[#allocation2 + $0x18] sm:$0xff]  ;;  %v690_v22 = vld [vmem:[#allocation5 + $0x48] sm:$0xff]  ;;  %s564_s2 = sshll.u32 %s830_s0, 4  ;;  %s565_s2 = int_to_ptr.vmem [resolvable:$true] %s564_s2 }
  0x15   :  { %v680_v19 = vld [vmem:[#allocation2 + $0x38] sm:$0xff]  ;;  %v691_v21 = vld [vmem:[#allocation5 + $0x50] sm:$0xff]  ;;  %v689_v23 = vld [vmem:[#allocation5 + $0x40] sm:$0xff] }
  0x16   :  { %330 = vmatpush.bf16.msra.mxu1 %v695_v13  ;;  %706 = vmatpush.bf16.msra.mxu3 %v695_v13  ;;  %v692_v20 = vld [vmem:[#allocation5 + $0x58] sm:$0xff]  ;;  %v719_v25 = vld [vmem:[#allocation7] ss:$0 sm:$0xff] }
  0x17   :  { %192 = vmatpush.bf16.msra.mxu0 %v686_v2  ;;  %699 = vmatpush.bf16.msra.mxu2 %v686_v2 }
  0x1a   :  { %331 = vmatpush.bf16.msra.mxu1 %v694_v14  ;;  %707 = vmatpush.bf16.msra.mxu3 %v694_v14 }
  0x1b   :  { %193 = vmatpush.bf16.msra.mxu0 %v685_v3  ;;  %700 = vmatpush.bf16.msra.mxu2 %v685_v3 }
  0x1e   :  { %332 = vmatpush.bf16.msra.mxu1 %v693_v15  ;;  %708 = vmatpush.bf16.msra.mxu3 %v693_v15 }
  0x1f   :  { %194 = vmatpush.bf16.msra.mxu0 %v684_v4  ;;  %701 = vmatpush.bf16.msra.mxu2 %v684_v4 }
  0x22   :  { %333 = vmatpush.bf16.msra.mxu1 %v692_v20  ;;  %709 = vmatpush.bf16.msra.mxu3 %v692_v20  ;;  %v863_v20 = vld [vmem:[#allocation7 + $0x3] ss:$0 sm:$0xff] }
  0x23   :  { %195 = vmatpush.bf16.msra.mxu0 %v683_v5  ;;  %702 = vmatpush.bf16.msra.mxu2 %v683_v5 }
  0x26   :  { %334 = vmatpush.bf16.msra.mxu1 %v691_v21  ;;  %710 = vmatpush.bf16.msra.mxu3 %v691_v21  ;;  %v865_v21 = vld [vmem:[#allocation7 + $0x2] ss:$0 sm:$0xff] }
  0x27   :  { %196 = vmatpush.bf16.msra.mxu0 %v682_v6  ;;  %703 = vmatpush.bf16.msra.mxu2 %v682_v6 }
  0x2a   :  { %335 = vmatpush.bf16.msra.mxu1 %v690_v22  ;;  %711 = vmatpush.bf16.msra.mxu3 %v690_v22 }
  0x2b   :  { %197 = vmatpush.bf16.msra.mxu0 %v681_v7  ;;  %704 = vmatpush.bf16.msra.mxu2 %v681_v7 }
  0x2e   :  { %198 = vmatmul.bf16.vlgmr.msra.gmra.mxu0 %v673_v8  ;;  %218 = vmatmul.bf16.vlgmr.msra.gmra.mxu2 %v677_v9 }
  0x2f   :  { %336 = vmatpush.bf16.msra.mxu1 %v689_v23  ;;  %712 = vmatpush.bf16.msra.mxu3 %v689_v23 }
  0x3e   :  { %203 = vmatmul.bf16.gmra.mxu0 %v674_v10  ;;  %223 = vmatmul.bf16.gmra.mxu2 %v678_v11 }
  0x4e   :  { %208 = vmatmul.bf16.gmra.mxu0 %v675_v16  ;;  %228 = vmatmul.bf16.gmra.mxu2 %v679_v17  ;;  %v860_v17 = vld [vmem:[#allocation7 + $0x1] ss:$0 sm:$0xff] }
  0x5e   :  { %213 = vmatmul.bf16.gmra.mxu0 %v676_v18  ;;  %233 = vmatmul.bf16.gmra.mxu2 %v680_v19 }
  0xab   :  { %v199_v24 = vpop.f32.mrf.mxu0 }
  0xac   :  { %v200_v27 = vadd.f32 %v719_v25, %v199_v24 }
  0xae   :  { %v239_v30 = vmax.f32 %v200_v27, 0.0 }
  0xb1   :  { %v219_v26 = vpop.f32.mrf.mxu2 }
  0xb2   :  { %v220_v32 = vadd.f32 %v719_v25, %v219_v26 }
  0xb3   :  { %v201_v28 = vpop.f32.mrf.mxu0 }
  0xb4   :  { %v202_v29 = vadd.f32 %v719_v25, %v201_v28  ;;  %v247_v37 = vmax.f32 %v220_v32, 0.0 }
  0xb6   :  { %v240_v31 = vmax.f32 %v202_v29, 0.0 }
  0xb8   :  { %v255_v33 = vpack.c.bf16 %v240_v31, %v239_v30 }
  0xb9   :  { %v221_v34 = vpop.f32.mrf.mxu2 }
  0xba   :  { %v222_v35 = vadd.f32 %v719_v25, %v221_v34  ;;  %337 = vmatmul.bf16.vlgmr.msra.gmra.mxu1 %v255_v33 }
  0xbb   :  { %v204_v36 = vpop.f32.mrf.mxu0 }
  0xbc   :  { %v248_v38 = vmax.f32 %v222_v35, 0.0  ;;  %v205_v41 = vadd.f32 %v719_v25, %v204_v36 }
  0xbe   :  { %v259_v39 = vpack.c.bf16 %v248_v38, %v247_v37  ;;  %v241_v44 = vmax.f32 %v205_v41, 0.0 }
  0xc0   :  { %357 = vmatmul.bf16.vlgmr.msra.gmra.mxu3 %v259_v39 }
  0xc1   :  { %v224_v40 = vpop.f32.mrf.mxu2 }
  0xc2   :  { %v225_v46 = vadd.f32 %v719_v25, %v224_v40 }
  0xc3   :  { %v206_v42 = vpop.f32.mrf.mxu0 }
  0xc4   :  { %v207_v43 = vadd.f32 %v719_v25, %v206_v42  ;;  %v249_v51 = vmax.f32 %v225_v46, 0.0 }
  0xc6   :  { %v242_v45 = vmax.f32 %v207_v43, 0.0 }
  0xc8   :  { %v256_v47 = vpack.c.bf16 %v242_v45, %v241_v44 }
  0xc9   :  { %v226_v48 = vpop.f32.mrf.mxu2 }
  0xca   :  { %v227_v49 = vadd.f32 %v719_v25, %v226_v48  ;;  %342 = vmatmul.bf16.gmra.mxu1 %v256_v47 }
  0xcb   :  { %v209_v50 = vpop.f32.mrf.mxu0 }
  0xcc   :  { %v250_v52 = vmax.f32 %v227_v49, 0.0  ;;  %v210_v55 = vadd.f32 %v719_v25, %v209_v50 }
  0xce   :  { %v260_v53 = vpack.c.bf16 %v250_v52, %v249_v51  ;;  %v243_v58 = vmax.f32 %v210_v55, 0.0 }
  0xd0   :  { %362 = vmatmul.bf16.gmra.mxu3 %v260_v53 }
  0xd1   :  { %v229_v54 = vpop.f32.mrf.mxu2 }
  0xd2   :  { %v230_v60 = vadd.f32 %v719_v25, %v229_v54 }
  0xd3   :  { %v211_v56 = vpop.f32.mrf.mxu0 }
  0xd4   :  { %v212_v57 = vadd.f32 %v719_v25, %v211_v56  ;;  %v251_v1 = vmax.f32 %v230_v60, 0.0 }
  0xd6   :  { %v244_v59 = vmax.f32 %v212_v57, 0.0 }
  0xd8   :  { %v257_v61 = vpack.c.bf16 %v244_v59, %v243_v58 }
  0xd9   :  { %v231_v62 = vpop.f32.mrf.mxu2 }
  0xda   :  { %v232_v63 = vadd.f32 %v719_v25, %v231_v62  ;;  %347 = vmatmul.bf16.gmra.mxu1 %v257_v61 }
  0xdb   :  { %v214_v0 = vpop.f32.mrf.mxu0 }
  0xdc   :  { %v252_v2 = vmax.f32 %v232_v63, 0.0  ;;  %v215_v5 = vadd.f32 %v719_v25, %v214_v0 }
  0xde   :  { %v261_v3 = vpack.c.bf16 %v252_v2, %v251_v1  ;;  %v245_v8 = vmax.f32 %v215_v5, 0.0 }
  0xe0   :  { %367 = vmatmul.bf16.gmra.mxu3 %v261_v3 }
  0xe1   :  { %v234_v4 = vpop.f32.mrf.mxu2 }
  0xe2   :  { %v235_v10 = vadd.f32 %v719_v25, %v234_v4 }
  0xe3   :  { %v216_v6 = vpop.f32.mrf.mxu0 }
  0xe4   :  { %v217_v7 = vadd.f32 %v719_v25, %v216_v6  ;;  %v253_v14 = vmax.f32 %v235_v10, 0.0 }
  0xe6   :  { %v246_v9 = vmax.f32 %v217_v7, 0.0 }
  0xe8   :  { %v258_v11 = vpack.c.bf16 %v246_v9, %v245_v8 }
  0xe9   :  { %v236_v12 = vpop.f32.mrf.mxu2 }
  0xea   :  { %v237_v13 = vadd.f32 %v719_v25, %v236_v12  ;;  %352 = vmatmul.bf16.gmra.mxu1 %v258_v11 }
  0xec   :  { %v254_v15 = vmax.f32 %v237_v13, 0.0 }
  0xee   :  { %v262_v16 = vpack.c.bf16 %v254_v15, %v253_v14 }
  0xf0   :  { %372 = vmatmul.bf16.gmra.mxu3 %v262_v16 }
 0x137   :  { %v338_v18 = vpop.f32.mrf.mxu1 }
 0x138   :  { %v339_v19 = vadd.f32 %v860_v17, %v338_v18 }
 0x13a   :  { %v378_v22 = vmax.f32 %v339_v19, 0.0  ;;  %v414_v24 = vmul.f32 %v863_v20, %v339_v19 }
 0x13c   :  { %v396_v23 = vmul.f32 %v865_v21, %v378_v22 }
 0x13e   :  { %v430_v25 = vadd.f32 %v414_v24, %v396_v23 }
 0x13f   :  { %v340_v26 = vpop.f32.mrf.mxu1 }
 0x140   :  { %v341_v27 = vadd.f32 %v860_v17, %v340_v26  ;;  %446 = vadd.xlane.f32.xlu0 %v430_v25 }
 0x142   :  { %v379_v28 = vmax.f32 %v341_v27, 0.0  ;;  %v415_v30 = vmul.f32 %v863_v20, %v341_v27 }
 0x143   :  { %v358_v29 = vpop.f32.mrf.mxu3 }
 0x144   :  { %v359_v31 = vadd.f32 %v860_v17, %v358_v29  ;;  %v397_v32 = vmul.f32 %v865_v21, %v379_v28 }
 0x146   :  { %v386_v33 = vmax.f32 %v359_v31, 0.0  ;;  %v431_v34 = vadd.f32 %v415_v30, %v397_v32  ;;  %v422_v38 = vmul.f32 %v863_v20, %v359_v31 }
 0x147   :  { %v343_v35 = vpop.f32.mrf.mxu1 }
 0x148   :  { %v344_v36 = vadd.f32 %v860_v17, %v343_v35  ;;  %448 = vadd.xlane.f32.xlu0 %v431_v34  ;;  %v404_v37 = vmul.f32 %v865_v21, %v386_v33 }
 0x14a   :  { %v380_v39 = vmax.f32 %v344_v36, 0.0  ;;  %v438_v40 = vadd.f32 %v422_v38, %v404_v37  ;;  %v416_v44 = vmul.f32 %v863_v20, %v344_v36 }
 0x14b   :  { %v360_v41 = vpop.f32.mrf.mxu3 }
 0x14c   :  { %v361_v42 = vadd.f32 %v860_v17, %v360_v41  ;;  %462 = vadd.xlane.f32.xlu2 %v438_v40  ;;  %v398_v43 = vmul.f32 %v865_v21, %v380_v39 }
 0x14e   :  { %v387_v45 = vmax.f32 %v361_v42, 0.0  ;;  %v432_v46 = vadd.f32 %v416_v44, %v398_v43  ;;  %v423_v48 = vmul.f32 %v863_v20, %v361_v42 }
 0x14f   :  { %v345_v47 = vpop.f32.mrf.mxu1 }
 0x150   :  { %v346_v49 = vadd.f32 %v860_v17, %v345_v47  ;;  %450 = vadd.xlane.f32.xlu1 %v432_v46  ;;  %v405_v50 = vmul.f32 %v865_v21, %v387_v45 }
 0x152   :  { %v381_v51 = vmax.f32 %v346_v49, 0.0  ;;  %v439_v52 = vadd.f32 %v423_v48, %v405_v50  ;;  %v417_v54 = vmul.f32 %v863_v20, %v346_v49 }
 0x153   :  { %v363_v53 = vpop.f32.mrf.mxu3 }
 0x154   :  { %v364_v55 = vadd.f32 %v860_v17, %v363_v53  ;;  %464 = vadd.xlane.f32.xlu0 %v439_v52  ;;  %v399_v56 = vmul.f32 %v865_v21, %v381_v51 }
 0x156   :  { %v388_v57 = vmax.f32 %v364_v55, 0.0  ;;  %v433_v58 = vadd.f32 %v417_v54, %v399_v56  ;;  %v424_v0 = vmul.f32 %v863_v20, %v364_v55 }
 0x157   :  { %v348_v59 = vpop.f32.mrf.mxu1 }
 0x158   :  { %v349_v60 = vadd.f32 %v860_v17, %v348_v59  ;;  %452 = vadd.xlane.f32.xlu1 %v433_v58  ;;  %v406_v62 = vmul.f32 %v865_v21, %v388_v57 }
 0x15a   :  { %v382_v61 = vmax.f32 %v349_v60, 0.0  ;;  %v418_v1 = vmul.f32 %v863_v20, %v349_v60  ;;  %v440_v4 = vadd.f32 %v424_v0, %v406_v62 }
 0x15b   :  { %v365_v63 = vpop.f32.mrf.mxu3 }
 0x15c   :  { %v400_v2 = vmul.f32 %v865_v21, %v382_v61  ;;  %v366_v7 = vadd.f32 %v860_v17, %v365_v63  ;;  %v494_v61 = vlaneseq }
 0x15e   :  { %v434_v3 = vadd.f32 %v418_v1, %v400_v2  ;;  %v389_v12 = vmax.f32 %v366_v7, 0.0  ;;  %v425_v23 = vmul.f32 %v863_v20, %v366_v7  ;;  %v495_v63 = vand.u32 127, %v494_v61 }
 0x15f   :  { %v350_v5 = vpop.f32.mrf.mxu1 }
 0x160   :  { %v351_v6 = vadd.f32 %v860_v17, %v350_v5  ;;  %454 = vadd.xlane.f32.xlu2 %v434_v3  ;;  %466 = vadd.xlane.f32.xlu1 %v440_v4  ;;  %v407_v19 = vmul.f32 %v865_v21, %v389_v12  ;;  %v501_v0 = vadd.s32 4294967280, %v495_v63  ;;  %v505_v1 = vadd.s32 4294967272, %v495_v63 }
 0x161   :  { %v509_v3 = vadd.s32 4294967264, %v495_v63  ;;  %v513_v5 = vadd.s32 4294967256, %v495_v63 }
 0x162   :  { %v383_v8 = vmax.f32 %v351_v6, 0.0  ;;  %v419_v10 = vmul.f32 %v863_v20, %v351_v6  ;;  %v441_v27 = vadd.f32 %v425_v23, %v407_v19  ;;  %v517_v6 = vadd.s32 4294967248, %v495_v63 }
 0x163   :  { %v368_v9 = vpop.f32.mrf.mxu3  ;;  %v533_v23 = vadd.s32 4294967216, %v495_v63 }
 0x164   :  { %v401_v11 = vmul.f32 %v865_v21, %v383_v8  ;;  %v369_v16 = vadd.f32 %v860_v17, %v368_v9 }
 0x166   :  { %v435_v13 = vadd.f32 %v419_v10, %v401_v11  ;;  %v390_v26 = vmax.f32 %v369_v16, 0.0  ;;  %v426_v35 = vmul.f32 %v863_v20, %v369_v16 }
 0x167   :  { %v353_v14 = vpop.f32.mrf.mxu1 }
 0x168   :  { %v354_v15 = vadd.f32 %v860_v17, %v353_v14  ;;  %456 = vadd.xlane.f32.xlu2 %v435_v13  ;;  %v408_v33 = vmul.f32 %v865_v21, %v390_v26  ;;  %v521_v13 = vadd.s32 4294967240, %v495_v63  ;;  %v525_v14 = vadd.s32 4294967232, %v495_v63 }
 0x169   :  { %v537_v26 = vadd.s32 4294967208, %v495_v63 }
 0x16a   :  { %v384_v18 = vmax.f32 %v354_v15, 0.0  ;;  %v420_v24 = vmul.f32 %v863_v20, %v354_v15  ;;  %v442_v42 = vadd.f32 %v426_v35, %v408_v33  ;;  %v541_v35 = vadd.s32 4294967200, %v495_v63 }
 0x16b   :  { %v370_v22 = vpop.f32.mrf.mxu3 }
 0x16c   :  { %v402_v25 = vmul.f32 %v865_v21, %v384_v18  ;;  %v371_v31 = vadd.f32 %v860_v17, %v370_v22  ;;  %v529_v18 = vadd.s32 4294967224, %v495_v63 }
 0x16e   :  { %v436_v28 = vadd.f32 %v420_v24, %v402_v25  ;;  %v391_v39 = vmax.f32 %v371_v31, 0.0  ;;  %v427_v48 = vmul.f32 %v863_v20, %v371_v31 }
 0x16f   :  { %v355_v29 = vpop.f32.mrf.mxu1 }
 0x170   :  { %v356_v30 = vadd.f32 %v860_v17, %v355_v29  ;;  %468 = vadd.xlane.f32.xlu2 %v441_v27  ;;  %458 = vadd.xlane.f32.xlu0 %v436_v28  ;;  %v409_v46 = vmul.f32 %v865_v21, %v391_v39  ;;  %v545_v39 = vadd.s32 4294967192, %v495_v63 }
 0x172   :  { %v385_v32 = vmax.f32 %v356_v30, 0.0  ;;  %v421_v36 = vmul.f32 %v863_v20, %v356_v30  ;;  %v443_v51 = vadd.f32 %v427_v48, %v409_v46 }
 0x173   :  { %v373_v34 = vpop.f32.mrf.mxu3 }
 0x174   :  { %v374_v37 = vadd.f32 %v860_v17, %v373_v34  ;;  %v403_v38 = vmul.f32 %v865_v21, %v385_v32 }
 0x176   :  { %v392_v40 = vmax.f32 %v374_v37, 0.0  ;;  %v437_v41 = vadd.f32 %v421_v36, %v403_v38  ;;  %v428_v43 = vmul.f32 %v863_v20, %v374_v37 }
 0x178   :  { %460 = vadd.xlane.f32.xlu1 %v437_v41  ;;  %470 = vadd.xlane.f32.xlu0 %v442_v42  ;;  %v410_v44 = vmul.f32 %v865_v21, %v392_v40 }
 0x17a   :  { %v444_v45 = vadd.f32 %v428_v43, %v410_v44  ;;  %v549_v43 = vadd.s32 4294967184, %v495_v63 }
 0x17b   :  { %v375_v47 = vpop.f32.mrf.mxu3 }
 0x17c   :  { %v376_v49 = vadd.f32 %v860_v17, %v375_v47  ;;  %474 = vadd.xlane.f32.xlu2 %v444_v45  ;;  %v497_v17 = vadd.s32 4294967288, %v495_v63  ;;  %v553_v47 = vadd.s32 4294967176, %v495_v63 }
 0x17e   :  { %v393_v50 = vmax.f32 %v376_v49, 0.0  ;;  %v429_v52 = vmul.f32 %v863_v20, %v376_v49 }
 0x180   :  { %472 = vadd.xlane.f32.xlu1 %v443_v51  ;;  %v411_v53 = vmul.f32 %v865_v21, %v393_v50 }
 0x182   :  { %v445_v54 = vadd.f32 %v429_v52, %v411_v53 }
 0x184   :  { %476 = vadd.xlane.f32.xlu0 %v445_v54 }
 0x1b3   :  { %v447_v55 = vpop.xlane.xlu0 %446 }
 0x1b4   :  { %v496_v8 = vperm.slane %v447_v55, %v495_v63 }
 0x1bb   :  { %v449_v58 = vpop.xlane.xlu0 %448 }
 0x1bc   :  { %v498_v4 = vperm.slane %v449_v58, %v497_v17 }
 0x1be   :  { %v500_v11 = vsel %vm499_vm0, %v498_v4, %v496_v8 }
 0x1bf   :  { %v463_v57 = vpop.xlane.xlu2 %462 }
 0x1c0   :  { %v526_v29 = vperm.slane %v463_v57, %v525_v14 }
 0x1c3   :  { %v451_v56 = vpop.xlane.xlu1 %450 }
 0x1c4   :  { %v502_v21 = vperm.slane %v451_v56, %v501_v0 }
 0x1c6   :  { %v504_v15 = vsel %vm503_vm1, %v502_v21, %v500_v11 }
 0x1c7   :  { %v465_v62 = vpop.xlane.xlu0 %464 }
 0x1c8   :  { %v530_v31 = vperm.slane %v465_v62, %v529_v18 }
 0x1cb   :  { %v453_v60 = vpop.xlane.xlu1 %452 }
 0x1cc   :  { %v506_v9 = vperm.slane %v453_v60, %v505_v1 }
 0x1ce   :  { %v508_v19 = vsel %vm507_vm2, %v506_v9, %v504_v15 }
 0x1d3   :  { %v455_v59 = vpop.xlane.xlu2 %454  ;;  %v467_v20 = vpop.xlane.xlu1 %466 }
 0x1d4   :  { %v510_v10 = vperm.slane %v455_v59, %v509_v3  ;;  %v534_v33 = vperm.slane %v467_v20, %v533_v23 }
 0x1d6   :  { %v512_v22 = vsel %vm511_vm3, %v510_v10, %v508_v19 }
 0x1db   :  { %v457_v2 = vpop.xlane.xlu2 %456 }
 0x1dc   :  { %v514_v12 = vperm.slane %v457_v2, %v513_v5 }
 0x1de   :  { %v516_v25 = vsel %vm515_vm4, %v514_v12, %v512_v22 }
 0x1e3   :  { %v459_v7 = vpop.xlane.xlu0 %458  ;;  %v469_v27 = vpop.xlane.xlu2 %468 }
 0x1e4   :  { %v518_v16 = vperm.slane %v459_v7, %v517_v6  ;;  %v538_v37 = vperm.slane %v469_v27, %v537_v26 }
 0x1e6   :  { %v520_v30 = vsel %vm519_vm5, %v518_v16, %v516_v25 }
 0x1eb   :  { %v461_v24 = vpop.xlane.xlu1 %460  ;;  %v471_v36 = vpop.xlane.xlu0 %470 }
 0x1ec   :  { %v522_v28 = vperm.slane %v461_v24, %v521_v13  ;;  %v542_v42 = vperm.slane %v471_v36, %v541_v35 }
 0x1ee   :  { %v524_v32 = vsel %vm523_vm6, %v522_v28, %v520_v30 }
 0x1ef   :  { %v528_v34 = vsel %vm527_vm7, %v526_v29, %v524_v32  ;;  %v475_v45 = vpop.xlane.xlu2 %474 }
 0x1f0   :  { %v532_v38 = vsel %vm531_vm8, %v530_v31, %v528_v34  ;;  %v550_v50 = vperm.slane %v475_v45, %v549_v43 }
 0x1f1   :  { %v536_v40 = vsel %vm535_vm9, %v534_v33, %v532_v38 }
 0x1f2   :  { %v540_v41 = vsel %vm539_vm10, %v538_v37, %v536_v40 }
 0x1f3   :  { %v473_v44 = vpop.xlane.xlu1 %472  ;;  %v544_v48 = vsel %vm543_vm11, %v542_v42, %v540_v41 }
 0x1f4   :  { %v546_v46 = vperm.slane %v473_v44, %v545_v39 }
 0x1f6   :  { %v548_v49 = vsel %vm547_vm12, %v546_v46, %v544_v48 }
 0x1f7   :  { %v477_v51 = vpop.xlane.xlu0 %476  ;;  %v552_v53 = vsel %vm551_vm13, %v550_v50, %v548_v49 }
 0x1f8   :  { %v554_v52 = vperm.slane %v477_v51, %v553_v47 }
 0x1fa   :  { %v556_v54 = vsel %vm555_vm14, %v554_v52, %v552_v53 }
 0x1fb   :  { %558 = vst [vmem:[#allocation8] sm:$0x1] %v556_v54 }
 0x1fc   :  { %569 = dma.vmem_to_hbm [thread:$0]  %s565_s2, 16, %s567_s30, [#allocation4]  }
 0x1fd   :  { %823 = dma.done.wait [#allocation4], 16  }
 0x1fe   :  { %824 = vsyncadd [#allocation4], 4294967280 }
 0x1ff   :  { %574 = vsyncpa [#allocation3], 1 }
 0x200   :  { %575 = vsyncpa [#allocation6], 1 }
 0x201   :  { %576 = vsyncpa [#allocation4], 1 }

</bundles_post_ra>
